<compile_context>
chip_gen: v5e
topology: v5e:2x2
jax: 0.10.0
libtpu: 0.0.40
codegen_flags: <defaults>
</compile_context>

<pallas_src>
import functools

import jax
import jax.numpy as jnp
from jax.experimental import pallas as pl
from jax.experimental.pallas import tpu as pltpu


_TARGET_TILE_BYTES = 4 * 1024 * 1024   # ~4 MiB tiles: near HBM roofline, VMEM-safe
_MIN_PALLAS_ELEMS = 256 * 1024         # below this, fused XLA is strictly cheaper


def _round_up(a, b):
    return (a + b - 1) // b * b


def _scale_kernel(scale_ref, x_ref, o_ref, *, lr_mult):
    # scale_ref: (1,) f32 in SMEM; x_ref / o_ref: (tr, lanes) tile in VMEM.
    # |scale * lr_mult| rides the scalar path; one cast to the activation
    # dtype keeps the broadcast multiply native on the VPU.
    s = jnp.abs(scale_ref[0] * jnp.float32(lr_mult)).astype(x_ref.dtype)
    o_ref[...] = x_ref[...] * s


def _pick_tiling(rows, lanes, itemsize):
    """Pick sublane tile size tr and grid length for a (rows, lanes) slab."""
    max_tr = max(8, (_TARGET_TILE_BYTES // (lanes * itemsize)) // 8 * 8)
    if rows <= max_tr:
        if rows >= 16:
            # Split into two tiles so v7x's two TensorCores both get work.
            tr = _round_up(pl.cdiv(rows, 2), 8)
        else:
            # Single block equal to the full array dims (valid even if <8 rows).
            tr = rows
    else:
        n_tiles = pl.cdiv(rows, max_tr)
        if n_tiles % 2:
            n_tiles += 1              # keep the grid even for v7x TC balance
        tr = min(max_tr, _round_up(pl.cdiv(rows, n_tiles), 8))
    return tr, pl.cdiv(rows, tr)


def _scale_2d(x2d, scale_f32, lr_mult, tr, grid):
    rows, lanes = x2d.shape
    return pl.pallas_call(
        functools.partial(_scale_kernel, lr_mult=float(lr_mult)),
        out_shape=jax.ShapeDtypeStruct((rows, lanes), x2d.dtype),
        grid=(grid,),
        in_specs=[
            pl.BlockSpec(memory_space=pltpu.MemorySpace.SMEM),   # scalar param
            pl.BlockSpec((tr, lanes), lambda i: (i, 0)),         # activation tile
        ],
        out_specs=pl.BlockSpec((tr, lanes), lambda i: (i, 0)),
        compiler_params=pltpu.CompilerParams(
            dimension_semantics=("parallel",),
            vmem_limit_bytes=48 * 1024 * 1024,
        ),
    )(scale_f32, x2d)


def scale_layer(x, scale, lr_mult=1.0, *, min_pallas_elems=_MIN_PALLAS_ELEMS):
    """Pallas equivalent of ScaleLayer.forward: x * |scale * lr_mult|."""
    orig_shape = x.shape
    orig_dtype = x.dtype
    n = x.size

    # Fused-XLA fallback: tiny tensors (launch + plumbing dominates) and
    # non-float dtypes (casting the scale to the activation dtype in-kernel
    # would quantize it).
    if n == 0 or n < min_pallas_elems or not jnp.issubdtype(orig_dtype, jnp.floating):
        s = jnp.abs(scale.astype(jnp.float32) * jnp.float32(lr_mult))
        return (x * s).astype(orig_dtype)

    itemsize = jnp.dtype(orig_dtype).itemsize
    scale_f32 = scale.reshape(1).astype(jnp.float32)

    if n % 128 == 0:
        # Fast path: zero-copy reshape to a lane-dense slab (no pad, no slice).
        lanes = 512 if n % 512 == 0 else (256 if n % 256 == 0 else 128)
        rows = n // lanes
        x2d = x.reshape(rows, lanes)
        tr, grid = _pick_tiling(rows, lanes, itemsize)
        out2d = _scale_2d(x2d, scale_f32, lr_mult, tr, grid)
        return out2d.reshape(orig_shape)

    # Slow path (only when n % 128 != 0): pad to whole 128-lane rows.  The pad
    # and the static [:n] slice each cost an extra HBM pass — unavoidable for
    # non-lane-aligned sizes.
    lanes = 128
    rows = pl.cdiv(n, lanes)
    flat = jnp.pad(x.reshape(-1), (0, rows * lanes - n))
    x2d = flat.reshape(rows, lanes)
    tr, grid = _pick_tiling(rows, lanes, itemsize)
    out2d = _scale_2d(x2d, scale_f32, lr_mult, tr, grid)
    return out2d.reshape(-1)[:n].reshape(orig_shape)


if __name__ == "__main__":
    # Deterministic parameter init matching the module's __init__:
    #   scale = full((1,), init_value / lr_mult)
    init_value = 1.0
    lr_mult = 2.0
    scale = jnp.full((1,), init_value / lr_mult, dtype=jnp.float32)

    key = jax.random.PRNGKey(0)
    x = jax.random.normal(key, (2, 4, 16, 16), dtype=jnp.float32)

    # min_pallas_elems=0 forces the Pallas path so the kernel itself is run
    # and verified at this small test shape (the default threshold would take
    # the fused-XLA small-tensor fallback).
    out = scale_layer(x, scale, lr_mult=lr_mult, min_pallas_elems=0)
    out = jax.block_until_ready(out)

    ref = x * jnp.abs(scale * lr_mult)
    assert out.shape == x.shape and out.dtype == x.dtype
    assert jnp.allclose(out, ref, atol=1e-6, rtol=1e-6)

    # Extra coverage: a multi-tile (even-grid, zero-copy fast-path) slab
    # through the same kernel.
    x2 = jax.random.normal(jax.random.PRNGKey(1), (1, 16, 128, 128), dtype=jnp.float32)
    out2 = jax.block_until_ready(
        scale_layer(x2, scale, lr_mult=lr_mult, min_pallas_elems=0))
    ref2 = x2 * jnp.abs(scale * lr_mult)
    assert jnp.allclose(out2, ref2, atol=1e-6, rtol=1e-6)

    print("KERNEL_OK")
</pallas_src>

<mosaic_0001>
module attributes {stable_mosaic.version = 11 : i64} {
  func.func @_scale_kernel(%arg0: i32, %arg1: memref<1xf32, #tpu.memory_space<smem>>, %arg2: memref<4x512xf32, #tpu.memory_space<vmem>>, %arg3: memref<4x512xf32, #tpu.memory_space<vmem>>) attributes {dimension_semantics = [#tpu.dimension_semantics<parallel>], iteration_bounds = array<i64: 1>, scalar_prefetch = 0 : i64, scratch_operands = 0 : i64, tpu.core_type = #tpu.core_type<tc>, window_params = [{transform_indices = @transform_0, window_bounds = array<i64: 1>}, {transform_indices = @transform_1, window_bounds = array<i64: 4, 512>}, {transform_indices = @transform_2, window_bounds = array<i64: 4, 512>}]} {
    %c0 = arith.constant 0 : index
    %0 = memref.load %arg1[%c0] : memref<1xf32, #tpu.memory_space<smem>>
    %cst = arith.constant 2.000000e+00 : f32
    %1 = arith.mulf %0, %cst : f32
    %2 = math.absf %1 : f32
    %c0_0 = arith.constant 0 : index
    %c0_1 = arith.constant 0 : index
    %3 = vector.load %arg2[%c0_0, %c0_1] : memref<4x512xf32, #tpu.memory_space<vmem>>, vector<4x512xf32>
    %4 = vector.broadcast %2 : f32 to vector<4x512xf32>
    %5 = arith.mulf %3, %4 : vector<4x512xf32>
    %c0_2 = arith.constant 0 : index
    %c0_3 = arith.constant 0 : index
    %6 = vector.load %arg3[%c0_2, %c0_3] : memref<4x512xf32, #tpu.memory_space<vmem>>, vector<4x512xf32>
    tpu.vector_store %arg3[%c0_2, %c0_3], %5 {strides = array<i32>} : memref<4x512xf32, #tpu.memory_space<vmem>>, vector<4x512xf32>,
    return
  }
  func.func @transform_0(%arg0: i32) -> i32 {
    %c0_i32 = arith.constant 0 : i32
    %c0_i32_0 = arith.constant 0 : i32
    return %c0_i32 : i32
  }
  func.func @transform_1(%arg0: i32) -> (i32, i32) {
    %c0_i32 = arith.constant 0 : i32
    %c0_i32_0 = arith.constant 0 : i32
    return %arg0, %c0_i32 : i32, i32
  }
  func.func @transform_2(%arg0: i32) -> (i32, i32) {
    %c0_i32 = arith.constant 0 : i32
    %c0_i32_0 = arith.constant 0 : i32
    return %arg0, %c0_i32 : i32, i32
  }
}

</mosaic_0001>

<bundles_post_ra>
// kernel: tpu_custom_call.1
= control target key start
LH: loop header
LB: loop body
LE: loop exit
PB: predicated region body
PF: predicated region fallthrough
CT: control target
= control target key end

     0   :  { %8 = vsyncpa [#allocation4], 0  ;;  %s134_s0 = inlined_call_operand.<no memory space> [shape: f32[1], index: 0, kind: input, shape index: {}]   ;;  %s135_s1 = inlined_call_operand.hbm [shape: f32[4,512], index: 1, kind: input, shape index: {}]   ;;  %s136_s2 = inlined_call_operand.hbm [shape: f32[4,512], index: 2, kind: output, shape index: {}]  }
   0x1   :  { %9 = vsyncpa [#allocation5], 0  ;;  %s17_s11 = sshll.u32 %s135_s1, 4  ;;  %s108_s12 = smov [#allocation3]   ;;  %s18_s11 = int_to_ptr.hbm [resolvable:$true] %s17_s11 }
   0x2   :  { %s19_s13 = sshll.u32 %s108_s12, 4  ;;  %s20_s13 = int_to_ptr.vmem [resolvable:$true] %s19_s13 }
   0x3   :  { %22 = dma.hbm_to_vmem [thread:$0]  %s18_s11, 256, %s20_s13, [#allocation4]  }
   0x4   :  { %104 = dma.done.wait [#allocation4], 256  }
   0x5   :  { %105 = vsyncadd [#allocation4], 4294967040  ;;  %s28_s16 = smul.f32 2.0, %s134_s0  ;;  %s109_s18 = smov [#allocation6]   ;;  %v30_v1 = vld [vmem:[#allocation3] sm:$0xff]  ;;  %v31_v2 = vld [vmem:[#allocation3 + $0x8] sm:$0xff] }
   0x6   :  { %s42_s19 = sshll.u32 %s109_s18, 4  ;;  %s44_s22 = sshll.u32 %s136_s2, 4  ;;  %s43_s19 = int_to_ptr.vmem [resolvable:$true] %s42_s19  ;;  %s45_s22 = int_to_ptr.hbm [resolvable:$true] %s44_s22 }
   0x7   :  { %s29_s17 = sand.u32 2147483647, %s28_s16 }
   0x8   :  { %v32_v0 = vstv %s29_s17 }
   0x9   :  { %v33_v3 = vmul.f32 %v32_v0, %v30_v1  ;;  %v34_v4 = vmul.f32 %v32_v0, %v31_v2 }
   0xb   :  { %35 = vst [vmem:[#allocation6] sm:$0xff] %v33_v3 }
   0xc   :  { %36 = vst [vmem:[#allocation6 + $0x8] sm:$0xff] %v34_v4 }
   0xd   :  { %47 = dma.vmem_to_hbm [thread:$0]  %s43_s19, 256, %s45_s22, [#allocation5]  }
   0xe   :  { %106 = dma.done.wait [#allocation5], 256  }
   0xf   :  { %107 = vsyncadd [#allocation5], 4294967040 }
  0x10   :  { %52 = vsyncpa [#allocation4], 1 }
  0x11   :  { %53 = vsyncpa [#allocation5], 1 }

</bundles_post_ra>
